<compile_context>
chip_gen: v7x
topology: tpu7x:2x2x1
jax: 0.10.0
libtpu: 0.0.40
codegen_flags: <defaults>
</compile_context>

<pallas_src>
import functools

import jax
import jax.numpy as jnp
from jax.experimental import pallas as pl
from jax.experimental.pallas import tpu as pltpu

# Large negative finite (not -inf): masked entries exp to exactly 0, no NaNs.
NEG_INF = -1e30


def _vmem_limit_bytes(frac=0.75, fallback=48 * 1024 * 1024):
    """Per-generation scoped-VMEM budget (v5e/v6e ~96 MiB, v7x ~48 MiB)."""
    try:
        cap = pltpu.get_tpu_info().vmem_capacity_bytes
        return int(cap * frac)
    except Exception:
        return fallback


def _pick_tile(s):
    """Largest MXU/sublane-friendly tile that divides S."""
    for t in (256, 128, 64, 32, 16):
        if s % t == 0:
            return t
    return s  # tiny sequences: one full-dim block


# --------------------------- Stage 1: fused QKV projection ---------------------------

def qkv_proj_kernel(x_ref, w_ref, y_ref):
    x = x_ref[0].astype(jnp.bfloat16)                                   # (ts, E)
    # One long MXU run with N = dq + 2*dkv; single lane-dense store.
    y_ref[0] = jnp.dot(x, w_ref[...],
                       preferred_element_type=jnp.float32).astype(y_ref.dtype)


def qkv_projection(x, w_cat, *, seq_tile):
    B, S, E = x.shape
    C = w_cat.shape[1]
    n_s = S // seq_tile
    return pl.pallas_call(
        qkv_proj_kernel,
        out_shape=jax.ShapeDtypeStruct((B, S, C), jnp.bfloat16),
        grid_spec=pltpu.PrefetchScalarGridSpec(
            num_scalar_prefetch=0,
            grid=(B, n_s),
            in_specs=[
                pl.BlockSpec((1, seq_tile, E), lambda b, si: (b, si, 0)),
                pl.BlockSpec((E, C), lambda b, si: (0, 0)),
            ],
            out_specs=pl.BlockSpec((1, seq_tile, C), lambda b, si: (b, si, 0)),
        ),
        compiler_params=pltpu.CompilerParams(
            dimension_semantics=("parallel", "parallel"),
            vmem_limit_bytes=_vmem_limit_bytes(),
        ),
    )(x, w_cat)


# --------------- Stage 2: flash-style grouped causal attention + fused Wo ---------------

def flash_gqa_kernel(q_ref, k_ref, v_ref, wo_ref, o_ref, m_sc, l_sc, acc_sc,
                     *, num_heads, num_groups, q_tile, kv_tile):
    qi = pl.program_id(1)
    ki = pl.program_id(2)
    G = num_groups
    rep = num_heads // num_groups

    @pl.when(ki == 0)
    def _init():
        m_sc[...] = jnp.full_like(m_sc, NEG_INF)
        l_sc[...] = jnp.zeros_like(l_sc)
        acc_sc[...] = jnp.zeros_like(acc_sc)

    # Causal skip: with q_tile == kv_tile, any KV tile strictly above the
    # diagonal (ki > qi) is fully masked -> skip all compute (its DMA is also
    # suppressed by the clamped index_map below).
    @pl.when(ki <= qi)
    def _update():
        # (G, rep, tq, hd) -> (G, rep*tq, hd): sublane-aligned merge (tq % 8 == 0),
        # so all rep heads of a group share one batched MXU instance (M = rep*tq),
        # contracting against UN-replicated K/V.
        q = q_ref[0].reshape(G, rep * q_tile, -1)          # (G, rep*tq, hd) bf16
        k = k_ref[0]                                        # (G, tk, hd) bf16
        v = v_ref[0]                                        # (G, tk, hd) bf16

        s = jax.lax.dot_general(
            q, k, (((2,), (2,)), ((0,), (0,))),
            preferred_element_type=jnp.float32)             # (G, rep*tq, tk) f32

        # Causal mask as an additive bias: non-zero only on the diagonal tile.
        rowt = jax.lax.broadcasted_iota(jnp.int32, (q_tile, kv_tile), 0)
        col = jax.lax.broadcasted_iota(jnp.int32, (q_tile, kv_tile), 1)
        diag_bias = jnp.where(rowt >= col, 0.0, NEG_INF).astype(jnp.float32)
        bias = jnp.tile(jnp.where(ki == qi, diag_bias, 0.0), (rep, 1))
        s = s + bias[None]                                  # (G, rep*tq, tk)

        # Online softmax (f32 elementwise; normalization deferred to finalize).
        m_prev = m_sc[...]
        m_new = jnp.maximum(m_prev, jnp.max(s, axis=-1, keepdims=True))
        alpha = jnp.exp(m_prev - m_new)
        p = jnp.exp(s - m_new)
        l_sc[...] = alpha * l_sc[...] + jnp.sum(p, axis=-1, keepdims=True)
        pv = jax.lax.dot_general(
            p.astype(jnp.bfloat16), v, (((2,), (1,)), ((0,), (0,))),
            preferred_element_type=jnp.float32)             # (G, rep*tq, hd)
        acc_sc[...] = alpha * acc_sc[...] + pv
        m_sc[...] = m_new

    @pl.when(ki == pl.num_programs(2) - 1)
    def _finalize():
        # Deferred normalization; approx reciprocal runs on the idle EUP slot.
        inv_l = pl.reciprocal(l_sc[...], approx=True)
        attn = acc_sc[...] * inv_l                          # (G, rep*tq, hd) f32
        # (G, rep*tq, hd) -> (H, tq, hd); head index hm = g*rep + r (group-major,
        # matching the wo_gm row order). Sublane-aligned split -> free.
        attn = attn.reshape(num_heads, q_tile, -1).astype(jnp.bfloat16)
        # Fused output projection: ONE batched MXU contraction over all heads +
        # a leading-axis add-reduction (no per-head serial matmul chain; no
        # (S, E) pre-projection temporary ever hits HBM).
        # NOTE: for very large E, chunk this over head groups / output columns
        # to bound the (H, tq, E) f32 intermediate on v7x's 64 MiB VMEM.
        pe = jax.lax.dot_general(
            attn, wo_ref[...], (((2,), (1,)), ((0,), (0,))),
            preferred_element_type=jnp.float32)             # (H, tq, E)
        o_ref[0] = jnp.sum(pe, axis=0).astype(o_ref.dtype)


def flash_gqa(q5, k4, v4, wo_gm, *, out_dtype, q_tile, kv_tile):
    B, G, rep, S, hd = q5.shape
    H = G * rep
    E = wo_gm.shape[-1]
    assert q_tile == kv_tile and S % q_tile == 0
    n_q = S // q_tile
    n_kv = S // kv_tile
    kernel = functools.partial(
        flash_gqa_kernel, num_heads=H, num_groups=G,
        q_tile=q_tile, kv_tile=kv_tile)
    return pl.pallas_call(
        kernel,
        out_shape=jax.ShapeDtypeStruct((B, S, E), out_dtype),
        grid_spec=pltpu.PrefetchScalarGridSpec(
            num_scalar_prefetch=0,
            grid=(B, n_q, n_kv),
            in_specs=[
                pl.BlockSpec((1, G, rep, q_tile, hd),
                             lambda b, qi, ki: (b, 0, 0, qi, 0)),
                # min(ki, qi): fully-masked (skipped) KV tiles keep the previous
                # block index, so no DMA is issued for them (~2x less K/V HBM
                # read for the triangular causal pattern).
                pl.BlockSpec((1, G, kv_tile, hd),
                             lambda b, qi, ki: (b, 0, jnp.minimum(ki, qi), 0)),
                pl.BlockSpec((1, G, kv_tile, hd),
                             lambda b, qi, ki: (b, 0, jnp.minimum(ki, qi), 0)),
                pl.BlockSpec(wo_gm.shape, lambda b, qi, ki: (0, 0, 0)),
            ],
            out_specs=pl.BlockSpec((1, q_tile, E), lambda b, qi, ki: (b, qi, 0)),
            scratch_shapes=[
                pltpu.VMEM((G, rep * q_tile, 1), jnp.float32),   # running max
                pltpu.VMEM((G, rep * q_tile, 1), jnp.float32),   # running denom
                pltpu.VMEM((G, rep * q_tile, hd), jnp.float32),  # unnormalized PV
            ],
        ),
        compiler_params=pltpu.CompilerParams(
            # Two parallel axes (megacore / 2-TC v7x), KV reduction innermost.
            dimension_semantics=("parallel", "parallel", "arbitrary"),
            vmem_limit_bytes=_vmem_limit_bytes(),
        ),
    )(q5, k4, v4, wo_gm)


# ------------------------------------ Wrapper ------------------------------------

def prepare_gqa_params(wq_t, wk_t, wv_t, wo_t, *, num_heads, num_groups, head_dim):
    """One-time weight prep (hoisted out of the forward path).

    torch head index h = r*G + g (rep-major); the kernels use group-major
    hm = g*rep + r so that heads of a group are contiguous in the M dimension.
    """
    E = wq_t.shape[0]
    G = num_groups
    rep = num_heads // num_groups
    hd = head_dim
    scale = 1.0 / (hd ** 0.5)
    # Wq columns reordered to group-major (g, r, d); softmax scale folded in.
    wq_gm = (wq_t * scale).reshape(E, rep, G, hd).transpose(0, 2, 1, 3)
    wq_gm = wq_gm.reshape(E, num_heads * hd)
    # Fused projection weight [Wq_gm | Wk | Wv]  -> one wide MXU run per tile.
    w_cat = jnp.concatenate([wq_gm, wk_t, wv_t], axis=1).astype(jnp.bfloat16)
    # Wo^T rows reordered to group-major head order, split per head: (H, hd, E).
    wo_gm = wo_t.reshape(rep, G, hd, E).transpose(1, 0, 2, 3)
    wo_gm = wo_gm.reshape(num_heads, hd, E).astype(jnp.bfloat16)
    return w_cat, wo_gm


def grouped_query_attention(x, w_cat, wo_gm, *, num_heads, num_groups, head_dim,
                            seq_tile=None):
    """x: (B, S, E); w_cat: (E, dq+2*dkv) fused weight; wo_gm: (H, hd, E)."""
    B, S, E = x.shape
    G = num_groups
    rep = num_heads // num_groups
    hd = head_dim
    dq = num_heads * hd
    dkv = G * hd
    if seq_tile is None:
        seq_tile = _pick_tile(S)
    assert S % seq_tile == 0

    qkv = qkv_projection(x, w_cat, seq_tile=seq_tile)       # (B, S, dq+2*dkv) bf16

    q = qkv[..., :dq]                    # columns already group-major (g, r, d)
    k = qkv[..., dq:dq + dkv]
    v = qkv[..., dq + dkv:]
    # TODO(synk): these reshape+transposes are XLA copies (one extra HBM round
    # trip for Q/K/V); folding them away needs an in-kernel head-split relayout.
    q5 = q.reshape(B, S, G, rep, hd).transpose(0, 2, 3, 1, 4)   # (B, G, rep, S, hd)
    k4 = k.reshape(B, S, G, hd).transpose(0, 2, 1, 3)           # (B, G, S, hd)
    v4 = v.reshape(B, S, G, hd).transpose(0, 2, 1, 3)           # (B, G, S, hd)

    return flash_gqa(q5, k4, v4, wo_gm, out_dtype=x.dtype,
                     q_tile=seq_tile, kv_tile=seq_tile)


def reference_gqa(x, wq_t, wk_t, wv_t, wo_t, *, num_heads, num_groups, head_dim):
    """Pure-JAX f32 reference mirroring the PyTorch forward exactly."""
    B, S, E = x.shape
    key = (x @ wk_t).reshape(B, S, num_groups, head_dim).transpose(0, 2, 1, 3)
    query = (x @ wq_t).reshape(B, S, num_heads, head_dim).transpose(0, 2, 1, 3)
    value = (x @ wv_t).reshape(B, S, num_groups, head_dim).transpose(0, 2, 1, 3)
    query = query.reshape(B, num_heads // num_groups, num_groups, S, head_dim)
    kq = jnp.einsum('brgsd,bgtd->brgst', query, key) / (head_dim ** 0.5)
    mask = jnp.tril(jnp.ones((S, S), dtype=bool))
    kq = jnp.where(mask, kq, -jnp.inf)
    p = jax.nn.softmax(kq, axis=-1)
    out = jnp.einsum('brgst,bgtd->brgsd', p, value)
    out = out.reshape(B, num_heads, S, head_dim).transpose(0, 2, 1, 3).reshape(B, S, E)
    return out @ wo_t


if __name__ == "__main__":
    # config: emb_dim=64, n_heads=4, n_groups=2 -> head_dim=16
    B, S, E = 2, 64, 64
    H, G = 4, 2
    HD = E // H
    dtype = jnp.float32

    key = jax.random.PRNGKey(0)
    kx, kq, kk, kv, ko = jax.random.split(key, 5)

    bound = 1.0 / (E ** 0.5)  # torch.nn.Linear default init scale
    x = jax.random.normal(kx, (B, S, E), dtype=dtype)
    # Weights stored transposed (in, out) so kernels compute x @ W directly.
    wq_t = jax.random.uniform(kq, (E, H * HD), dtype=dtype, minval=-bound, maxval=bound)
    wk_t = jax.random.uniform(kk, (E, G * HD), dtype=dtype, minval=-bound, maxval=bound)
    wv_t = jax.random.uniform(kv, (E, G * HD), dtype=dtype, minval=-bound, maxval=bound)
    wo_t = jax.random.uniform(ko, (E, E), dtype=dtype, minval=-bound, maxval=bound)

    w_cat, wo_gm = prepare_gqa_params(
        wq_t, wk_t, wv_t, wo_t, num_heads=H, num_groups=G, head_dim=HD)

    # seq_tile=32 -> 2x2 (q-tile, kv-tile) grid: exercises the causal skip,
    # the diagonal-tile mask and multi-tile online softmax.
    out = grouped_query_attention(
        x, w_cat, wo_gm, num_heads=H, num_groups=G, head_dim=HD, seq_tile=32)
    out = jax.block_until_ready(out)

    ref = reference_gqa(
        x, wq_t, wk_t, wv_t, wo_t, num_heads=H, num_groups=G, head_dim=HD)
    assert out.shape == (B, S, E)
    # bf16 MXU operands (f32 accumulate) + approx reciprocal vs pure-f32 reference.
    max_diff = jnp.max(jnp.abs(out - ref))
    assert jnp.allclose(out, ref, atol=2e-2, rtol=2e-2), (
        f"mismatch vs reference, max abs diff {max_diff}")

    print("KERNEL_OK")
</pallas_src>

<mosaic_0001>
module attributes {stable_mosaic.version = 11 : i64} {
  func.func @qkv_proj_kernel(%arg0: i32, %arg1: i32, %arg2: memref<1x32x64xf32, #tpu.memory_space<vmem>>, %arg3: memref<64x128xbf16, #tpu.memory_space<vmem>>, %arg4: memref<1x32x128xbf16, #tpu.memory_space<vmem>>) attributes {dimension_semantics = [#tpu.dimension_semantics<parallel>, #tpu.dimension_semantics<parallel>], iteration_bounds = array<i64: 2, 2>, scalar_prefetch = 0 : i64, scratch_operands = 0 : i64, tpu.core_type = #tpu.core_type<tc>, window_params = [{transform_indices = @transform_0, window_bounds = array<i64: 1, 32, 64>}, {pipeline_mode = #tpu.pipeline_mode<synchronous>, transform_indices = @transform_1, window_bounds = array<i64: 64, 128>}, {transform_indices = @transform_2, window_bounds = array<i64: 1, 32, 128>}]} {
    %c0 = arith.constant 0 : index
    %c0_0 = arith.constant 0 : index
    %c0_1 = arith.constant 0 : index
    %0 = vector.load %arg2[%c0, %c0_0, %c0_1] : memref<1x32x64xf32, #tpu.memory_space<vmem>>, vector<1x32x64xf32>
    %1 = vector.shape_cast %0 : vector<1x32x64xf32> to vector<32x64xf32>
    %2 = arith.truncf %1 : vector<32x64xf32> to vector<32x64xbf16>
    %c0_2 = arith.constant 0 : index
    %c0_3 = arith.constant 0 : index
    %3 = vector.load %arg3[%c0_2, %c0_3] : memref<64x128xbf16, #tpu.memory_space<vmem>>, vector<64x128xbf16>
    %cst = arith.constant dense<0.000000e+00> : vector<32x128xf32>
    %4 = tpu.matmul %2, %3, %cst {dimension_numbers = #tpu.dot_dimension_numbers<[1], [0], [0], [1], [0, 0, 1, 1], [], []>} : vector<32x64xbf16>, vector<64x128xbf16>, vector<32x128xf32> -> vector<32x128xf32>
    %5 = arith.truncf %4 : vector<32x128xf32> to vector<32x128xbf16>
    %c0_4 = arith.constant 0 : index
    %c0_5 = arith.constant 0 : index
    %c0_6 = arith.constant 0 : index
    %6 = vector.load %arg4[%c0_4, %c0_5, %c0_6] : memref<1x32x128xbf16, #tpu.memory_space<vmem>>, vector<1x32x128xbf16>
    %7 = vector.shape_cast %6 : vector<1x32x128xbf16> to vector<32x128xbf16>
    %8 = vector.shape_cast %5 : vector<32x128xbf16> to vector<1x32x128xbf16>
    tpu.vector_store %arg4[%c0_4, %c0_5, %c0_6], %8 {strides = array<i32>} : memref<1x32x128xbf16, #tpu.memory_space<vmem>>, vector<1x32x128xbf16>,
    return
  }
  func.func @transform_0(%arg0: i32, %arg1: i32) -> (i32, i32, i32) {
    %c0_i32 = arith.constant 0 : i32
    %c0_i32_0 = arith.constant 0 : i32
    return %arg0, %arg1, %c0_i32 : i32, i32, i32
  }
  func.func @transform_1(%arg0: i32, %arg1: i32) -> (i32, i32) {
    %c0_i32 = arith.constant 0 : i32
    %c0_i32_0 = arith.constant 0 : i32
    %c0_i32_1 = arith.constant 0 : i32
    return %c0_i32, %c0_i32_0 : i32, i32
  }
  func.func @transform_2(%arg0: i32, %arg1: i32) -> (i32, i32, i32) {
    %c0_i32 = arith.constant 0 : i32
    %c0_i32_0 = arith.constant 0 : i32
    return %arg0, %arg1, %c0_i32 : i32, i32, i32
  }
}

</mosaic_0001>

<bundles_post_ra>
// kernel: tpu_custom_call.1
= control target key start
LH: loop header
LB: loop body
LE: loop exit
PB: predicated region body
PF: predicated region fallthrough
CT: control target
= control target key end

     0   :  { %s1019_s0 = inlined_call_operand.hbm [shape: f32[2,64,64], index: 0, kind: input, shape index: {}]   ;;  %s1020_s1 = inlined_call_operand.hbm [shape: bf16[64,128], index: 1, kind: input, shape index: {}]   ;;  %s1021_s2 = inlined_call_operand.hbm [shape: bf16[2,64,128], index: 2, kind: output, shape index: {}]  }
   0x1   :  { %1029 = sst [smem:[#allocation14_spill]] %s1020_s1 }
   0x2   :  { %7 = vsyncpa [#allocation3], 0 }
   0x3   :  { %9 = vsyncpa [#allocation3 + $0x1], 0 }
   0x4   :  { %10 = vsyncpa [#allocation6], 0 }
   0x5   :  { %11 = vsyncpa [#allocation4], 0 }
   0x6   :  { %13 = vsyncpa [#allocation4 + $0x1], 0  ;;  %s775_s9 = smov 0   ;;  %s777_s10 = smov 0  }
   0x7   :  { %s779_s11 = smov 0   ;;  %s781_s12 = smov 0  }
   0x8   :  { %s783_s13 = smov 0   ;;  %s785_s14 = smov 0  }
   0x9   :  { %s787_s15 = smov 0   ;;  %s789_s16 = smov 0  }
   0xa LB: > { %1030 = sst [smem:[#allocation11_spill]] %s741_s14  ;;  %s428_s17 = sadd.s32 4294967295, %s749_s16   ;;  %s749_s16 = sphi %s789_s16, %s19_s16   ;;  %s745_s15 = sphi %s787_s15, %s1055_s15   ;;  %s741_s14 = sphi %s785_s14, %s1049_s14   ;;  %s737_s13 = sphi %s783_s13, %s1054_s13   ;;  %s733_s12 = sphi %s781_s12, %s1048_s12   ;;  %s729_s11 = sphi %s779_s11, %s1053_s11   ;;  %s725_s10 = sphi %s777_s10, %s1052_s10   ;;  %s721_s9 = sphi %s775_s9, %s1051_s9  }
   0xb   : > { %s429_s18 = sadd.s32 4294967294, %s749_s16   ;;  %p53_p0 = scmp.ne.s32.totalorder %s725_s10, %s721_s9 }
   0xc   : > { %p819_p1 = scmp.eq.s32.totalorder %s428_s17, 0  ;;  %p823_p2 = scmp.eq.s32.totalorder %s428_s17, 3 }
   0xd   : > { %p106_p3 = scmp.eq.s32.totalorder %s429_s18, 3  ;;  %p430_p5 = scmp.ge.s32.totalorder %s749_s16, 1 }
   0xe   : > { %s1031_s19 = scalar_select %p819_p1, 1, 0 }
   0xf   : > { %s1032_s20 = scalar_select %p823_p2, 1, 0 }
  0x10   : > { %p829_p4 = por %p819_p1, %p53_p0  ;;  %p834_p6 = por %p106_p3, %p53_p0 }
  0x11   : > { %p113_p7 = scmp.lt.s32.totalorder %s749_s16, 5  ;;  %s751_s24 = smov [#allocation5]  }
  0x12   : > { %s1033_s21 = scalar_select %p829_p4, 1, 0 }
  0x13   : > { %s1034_s22 = scalar_select %p834_p6, 1, 0 }
  0x14   : > { %p839_p8 = pnand %p430_p5, %p113_p7  ;;  %s125_s25 = sshll.u32 %s751_s24, 4  ;;  %s126_s25 = int_to_ptr.vmem [resolvable:$true] %s125_s25 }
  0x15   : > { %s1037_s1 = sld [smem:[#allocation14_spill]] }
  0x16   : > { %s1035_s23 = scalar_select %p839_p8, 1, 0 }
  0x17   : > { %p498_p9 = pneg %p839_p8 }
  0x19   : > { %p847_p10 = pnand %p498_p9, %p819_p1 }
  0x1b   : > { %s589_s29 = scalar_lea.hbm %s1037_s1, 512  ;;  %p591_p12 = pneg %p847_p10 }
  0x1c   : > { %p590_p11 = scmp.ne.s32.totalorder %s1037_s1, %s589_s29  ;;  %p596_p3 = scmp.lt.u32.totalorder %s589_s29, %s1037_s1 }
  0x1e   : > { %p592_p13 = pnand %p591_p12, %p590_p11 }
  0x20   : > { %p593_p0 = pneg %p592_p13 }
  0x22   : > { %p598_p5 = pnand %p596_p3, %p593_p0 }
  0x24   : > { %601 = shalt.err (!%p598_p5)
}
  0x25   : > { %s602_s6 = scalar_lea.vmem %s126_s25, 512  ;;  %p610_p1 = scmp.lt.s32.totalorder %s126_s25, %s126_s25 }
  0x26   : > { %p603_p7 = scmp.ne.s32.totalorder %s126_s25, %s602_s6  ;;  %p611_p4 = scmp.lt.s32.totalorder %s602_s6, %s602_s6 }
  0x28   : > { %p605_p9 = pnand %p603_p7, %p591_p12  ;;  %p612_p8 = por %p611_p4, %p610_p1 }
  0x2a   : > { %p606_p6 = pneg %p605_p9 }
  0x2c   : > { %p613_p2 = pnand %p612_p8, %p606_p6 }
  0x2e   : > { %616 = shalt.err (!%p613_p2)
}
  0x2f   : > { %s752_s7 = smov 64   ;;  %s753_s8 = smov 4  }
  0x30   : > { %501 = dma.hbm_to_vmem [thread:$0]  (!%p847_p10), %s1037_s1, 512, %s126_s25, [#allocation6], %s752_s7, %s752_s7, %s753_s8  }
  0x31   : > { %s28_s24 = sadd.s32 1, %s741_s14  ;;  %s31_s27 = sadd.s32 1, %s745_s15 }
  0x32   : > { %p29_p1 = scmp.ge.s32.totalorder %s28_s24, 2  ;;  %s40_s28 = sadd.s32 1, %s729_s11 }
  0x33   : > { %p47_p2 = scmp.ne.s32.totalorder %s729_s11, %s725_s10  ;;  %p48_p4 = scmp.eq.s32.totalorder %s749_s16, 0 }
  0x34   : > { %s1057_s24 = smov (%p29_p1, %s28_s24), 0  ;;  %s1059_s27 = smov (!%p29_p1, %s31_s27), %s745_s15 }
  0x35   : > { %1038 = sst [smem:[#allocation12_spill]] %s1057_s24  ;;  %s36_s29 = ssub.s32 %s741_s14, %s1057_s24 }
  0x36   : > { %p33_p6 = scmp.ge.s32.totalorder %s1059_s27, 2  ;;  %p1039_p8 = scmp.ne.s32.totalorder %s1032_s20, 0 }
  0x37   : > { %p884_p10 = por %p48_p4, %p47_p2  ;;  %p511_p12 = scmp.lt.s32.totalorder %s749_s16, 4 }
  0x38   : > { %p880_p11 = por %p1039_p8, %p47_p2  ;;  %s1061_s27 = smov (%p33_p6, %s1059_s27), 0 }
  0x39   : > { %1042 = sst [smem:[#allocation13_spill]] %s1061_s27  ;;  %s139_s30 = sand.u32 1, %s729_s11  }
  0x3a   : > { %s434_s3 = sshll.u32 %s741_s14, 2  ;;  %s35_s4 = ssub.s32 %s745_s15, %s1061_s27 }
  0x3b   : > { %s37_s5 = sor.u32 %s36_s29, %s35_s4  ;;  %s433_s6 = sshll.u32 %s139_s30, 5 }
  0x3c   : > { %p38_p13 = scmp.eq.s32.totalorder %s37_s5, 0  ;;  %s435_s20 = sshll.u32 %s745_s15, 3 }
  0x3d   : > { %s143_s7 = scalar_lea.vmem [#allocation2], %s433_s6  ;;  %s149_s18 = sadd.s32 %s435_s20, %s434_s3 }
  0x3e   : > { %s152_s8 = sshll.u32 %s143_s7, 4  ;;  %s436_s1 = sshll.u32 %s149_s18, 7  ;;  %s899_s8 = int_to_ptr.vmem [resolvable:$true] %s152_s8 }
  0x3f   : > { %s897_s17 = scalar_select %p38_p13, %s729_s11, %s40_s28  }
  0x40   : > { %p905_p0 = pnand %p511_p12, %p884_p10  ;;  %s912_s29 = scalar_lea.hbm %s1019_s0, %s436_s1 }
  0x41   : > { %s914_s28 = scalar_lea.sflag [#allocation3], %s139_s30  ;;  %s617_s3 = scalar_lea.hbm %s912_s29, 512 }
  0x42   : > { %p618_p3 = scmp.ne.s32.totalorder %s912_s29, %s617_s3  ;;  %p619_p5 = pneg %p905_p0 }
  0x43   : > { %s622_s27 = scalar_lea.hbm %s1019_s0, 2048  ;;  %p623_p1 = scmp.lt.u32.totalorder %s912_s29, %s1019_s0 }
  0x44   : > { %p620_p7 = pnand %p619_p5, %p618_p3  ;;  %p624_p2 = scmp.lt.u32.totalorder %s622_s27, %s617_s3 }
  0x45   : > { %p626_p6 = scmp.lt.u32.totalorder %s617_s3, %s912_s29 }
  0x46   : > { %p621_p9 = pneg %p620_p7  ;;  %p625_p4 = por %p624_p2, %p623_p1 }
  0x48   : > { %p627_p8 = por %p626_p6, %p625_p4 }
  0x4a   : > { %p628_p10 = pnand %p627_p8, %p621_p9 }
  0x4c   : > { %631 = shalt.err (!%p628_p10)
}
  0x4d   : > { %s632_s30 = scalar_lea.vmem %s899_s8, 512  ;;  %s754_s5 = smov [#allocation2]  }
  0x4e   : > { %p633_p12 = scmp.ne.s32.totalorder %s899_s8, %s632_s30  ;;  %s637_s6 = sshll.u32 %s754_s5, 4  ;;  %s638_s6 = int_to_ptr.vmem [resolvable:$false] %s637_s6 }
  0x4f   : > { %s639_s20 = scalar_lea.vmem %s638_s6, 1024  ;;  %p640_p7 = scmp.lt.s32.totalorder %s899_s8, %s638_s6 }
  0x50   : > { %p635_p13 = pnand %p633_p12, %p619_p5  ;;  %p641_p1 = scmp.lt.s32.totalorder %s639_s20, %s632_s30 }
  0x52   : > { %p636_p3 = pneg %p635_p13  ;;  %p642_p2 = por %p641_p1, %p640_p7 }
  0x54   : > { %p643_p4 = pnand %p642_p2, %p636_p3 }
  0x56   : > { %646 = shalt.err (!%p643_p4)
}
  0x57   : > { %s755_s7 = smov 128   ;;  %s756_s18 = smov 8  }
  0x58   : > { %505 = dma.hbm_to_vmem [thread:$0]  (!%p905_p0), %s912_s29, 512, %s899_s8, %s914_s28, %s755_s7, %s755_s7, %s756_s18  }
  0x59   : > { %p1044_p5 = scmp.ne.s32.totalorder %s1035_s23, 0 }
  0x5a   : > { %s945_s3 = sand.u32 (!%p1044_p5), 1, %s725_s10   ;;  %p1045_p9 = scmp.ne.s32.totalorder (!%p1044_p5), %s1033_s21, 0 }
  0x5b   : > { %164 = sbr.rel (%p1044_p5) target bundleno = 351 (0x15f), region = 28  ;;  %s438_s25 = sshll.u32 (!%p1044_p5), %s945_s3, 5 }
  0x5c   : > { %s167_s14 = scalar_lea.sflag (!%p1044_p5), [#allocation3], %s945_s3  ;;  %s170_s27 = scalar_lea.vmem (!%p1044_p5), [#allocation2], %s438_s25 }
  0x62   : > { %708 = dma.done.wait (%p1045_p9), %s167_s14, 512  }
  0x63   : > { %710 = vsyncadd (%p1045_p9), %s167_s14, 4294966784  ;;  %p1046_p6 = scmp.ne.s32.totalorder %s1031_s19, 0 }
  0x65   : > { %712 = dma.done.wait (%p1046_p6), [#allocation6], 512  }
  0x66   : > { %714 = vsyncadd (%p1046_p6), [#allocation6], 4294966784  ;;  %v585_v0 = vld [vmem:[#allocation5] sm:$0xff]   ;;  %v586_v1 = vld [vmem:[#allocation5 + $0x8] sm:$0xff]   ;;  %vm236_vm0 = vcmask 523264   ;;  %s440_s19 = sshll.u32 %s945_s3, 4 }
  0x67   : > { %478 = vmatprep.subr.bf16.mxu0 %v585_v0  ;;  %v587_v2 = vld [vmem:[#allocation5 + $0x10] sm:$0xff]   ;;  %v198_v3 = vld [vmem:[%s170_s27] sm:$0xff]  ;;  %v199_v4 = vld [vmem:[%s170_s27 + $0x8] sm:$0xff]  ;;  %s452_s21 = sshll.u32 %s733_s12, 2  ;;  %s453_s23 = sshll.u32 %s737_s13, 3 }
  0x68   : > { %479 = vmatpush3.bf16.msra.mxu0 %v585_v0  ;;  %v202_v5 = vpack.c.bf16 %v199_v4, %v198_v3  ;;  %v588_v6 = vld [vmem:[#allocation5 + $0x18] sm:$0xff]   ;;  %v200_v7 = vld [vmem:[%s170_s27 + $0x10] sm:$0xff]  ;;  %s325_s24 = sadd.s32 %s453_s23, %s452_s21  ;;  %s194_s8 = scalar_lea.vmem [#allocation7], %s440_s19 }
  0x69   : > { %480 = vmatprep.subr.bf16.mxu0 %v586_v1  ;;  %v201_v8 = vld [vmem:[%s170_s27 + $0x18] sm:$0xff]  ;;  %s328_s29 = sshll.u32 %s194_s8, 4  ;;  %s454_s28 = sshll.u32 %s325_s24, 6  ;;  %s960_s29 = int_to_ptr.vmem [resolvable:$true] %s328_s29 }
  0x6a   : > { %486 = vmatprep.mubr.msk.bf16.mxu0 %vm236_vm0, %v202_v5  ;;  %v203_v9 = vpack.c.bf16 %v201_v8, %v200_v7  ;;  %s965_s12 = scalar_lea.hbm %s1021_s2, %s454_s28  ;;  %s313_s13 = scalar_lea.sflag [#allocation4], %s945_s3 }
  0x6b   : > { %s647_s30 = scalar_lea.vmem %s960_s29, 256  ;;  %s757_s5 = smov [#allocation7]  }
  0x6c   : > { %481 = vmatpush3.bf16.msra.mxu0 %v586_v1  ;;  %p648_p0 = scmp.ne.s32.totalorder %s960_s29, %s647_s30  ;;  %s651_s6 = sshll.u32 %s757_s5, 4  ;;  %s652_s6 = int_to_ptr.vmem [resolvable:$false] %s651_s6 }
  0x6d   : > { %482 = vmatprep.subr.bf16.mxu0 %v587_v2  ;;  %s653_s20 = scalar_lea.vmem %s652_s6, 512  ;;  %p654_p12 = scmp.lt.s32.totalorder %s960_s29, %s652_s6 }
  0x6e   : > { %p649_p8 = pnand %p648_p0, %p880_p11  ;;  %p655_p13 = scmp.lt.s32.totalorder %s653_s20, %s647_s30 }
  0x70   : > { %483 = vmatpush3.bf16.msra.mxu0 %v587_v2  ;;  %p650_p10 = pneg %p649_p8  ;;  %p656_p3 = por %p655_p13, %p654_p12 }
  0x71   : > { %484 = vmatprep.subr.bf16.mxu0 %v588_v6 }
  0x72   : > { %p657_p7 = pnand %p656_p3, %p650_p10 }
  0x74   : > { %485 = vmatpush3.bf16.msra.mxu0 %v588_v6 }
  0x77   : > { %487 = vmatmul.mubr.msk.bf16.vlgmr.msra.gmra.mrb[0].mxu0 %vm236_vm0, %v203_v9 }
 0x14a   : > { %v488_v10 = vpop.f32.mrb[0].mxu0 }
 0x14b   : > { %v277_v11 = vpop.f32.mrb[1].mxu0 }
 0x14c   : > { %v489_v12 = vpop.f32.mrb[2].mxu0 }
 0x14d   : > { %v469_v13 = vpack.c.bf16 %v489_v12, %v488_v10  ;;  %v280_v14 = vpop.f32.mrb[3].mxu0 }
 0x14e   : > { %v464_v15 = vpack.c.bf16 %v280_v14, %v277_v11 }
 0x14f   : > { %471 = vst [vmem:[%s194_s8 + $0x8] sm:$0xff] %v469_v13  }
 0x150   : > { %465 = vst [vmem:[%s194_s8] sm:$0xff] %v464_v15  }
 0x151   : > { %660 = shalt.err (!%p657_p7)
}
 0x152   : > { %s661_s7 = scalar_lea.hbm %s965_s12, 256  ;;  %s665_s14 = scalar_lea.hbm %s1021_s2, 1024 }
 0x153   : > { %p662_p1 = scmp.ne.s32.totalorder %s965_s12, %s661_s7  ;;  %p666_p5 = scmp.lt.u32.totalorder %s965_s12, %s1021_s2 }
 0x154   : > { %p667_p9 = scmp.lt.u32.totalorder %s665_s14, %s661_s7  ;;  %p669_p0 = scmp.lt.u32.totalorder %s661_s7, %s965_s12 }
 0x155   : > { %p663_p2 = pnand %p662_p1, %p880_p11 }
 0x156   : > { %p668_p6 = por %p667_p9, %p666_p5 }
 0x157   : > { %p664_p4 = pneg %p663_p2 }
 0x158   : > { %p670_p8 = por %p669_p0, %p668_p6 }
 0x15a   : > { %p671_p10 = pnand %p670_p8, %p664_p4 }
 0x15c   : > { %674 = shalt.err (!%p671_p10)
}
 0x15d   : > { %s758_s21 = smov 64   ;;  %s759_s23 = smov 4  }
 0x15e   : > { %496 = dma.vmem_to_hbm [thread:$0]  (%p880_p11), %s960_s29, 256, %s965_s12, %s313_s13, %s758_s21, %s758_s21, %s759_s23  }
 0x15f PF: > { %p513_p12 = scmp.ge.s32.totalorder %s749_s16, 2  ;;  %s343_s24 = sand.u32 1, %s721_s9  }
 0x160   : > { %p1047_p13 = scmp.ne.s32.totalorder %s1034_s22, 0  ;;  %s344_s8 = scalar_lea.sflag [#allocation4], %s343_s24 }
 0x162   : > { %p507_p3 = pnand %p513_p12, %p1047_p13 }
 0x164   : > { %716 = dma.done.wait (!%p507_p3), %s344_s8, 256  }
 0x165   : > { %718 = vsyncadd (!%p507_p3), %s344_s8, 4294967040  ;;  %s19_s16 = sadd.s32 1, %s749_s16   ;;  %s1048_s12 = sld [smem:[#allocation11_spill]] }
 0x166   : > { %p16_p7 = scmp.ge.s32.totalorder %s19_s16, 6   ;;  %s1049_s14 = sld [smem:[#allocation12_spill]] }
 0x167   : > { %s1050_s26 = sld [smem:[#allocation13_spill]]  ;;  %s1051_s9 = smov %s725_s10 }
 0x168   : > { %s1052_s10 = smov %s729_s11  ;;  %s1053_s11 = smov %s897_s17 }
 0x169   : > { %s1054_s13 = smov %s745_s15  ;;  %18 = sbr.rel (!%p16_p7) target bundleno = 10 (0xa), region = 77 }
 0x16d   : > { %s1055_s15 = smov %s1050_s26 }
 0x170   :  { %349 = vsyncpa [#allocation3], 1 }
 0x171   :  { %351 = vsyncpa [#allocation3 + $0x1], 1 }
 0x172   :  { %352 = vsyncpa [#allocation6], 1 }
 0x173   :  { %353 = vsyncpa [#allocation4], 1 }
 0x174   :  { %355 = vsyncpa [#allocation4 + $0x1], 1 }

</bundles_post_ra>
